<compile_context>
chip_gen: v5e
topology: v5e:2x2
jax: 0.10.0
libtpu: 0.0.40
codegen_flags: <defaults>
</compile_context>

<pallas_src>
import math

import jax
import jax.numpy as jnp
from jax.experimental import pallas as pl
from jax.experimental.pallas import tpu as pltpu


LANE = 128
BN_EPS = 1e-5  # torch.nn.BatchNorm1d default eps


# ----------------------------- Pallas kernel --------------------------------


def _make_kernel(num_layers, use_conv, pdims):
    """Builds the fused kernel.

    Ref order: x, [adj], w_0 .. w_{L-1}, b_last, out
      x:    [N, Pin_0]        bf16
      adj:  [N, N]            bf16 (only when use_conv)
      w_i:  [Pin_i, Pout_i]   bf16 (already transposed: stores W_i^T)
      b:    [1, Pout_last]    f32
      out:  [N, Pout_last]    f32
    """

    def kernel(*refs):
        it = iter(refs)
        x_ref = next(it)
        adj_ref = next(it) if use_conv else None
        w_refs = [next(it) for _ in range(num_layers)]
        b_ref = next(it)
        o_ref = next(it)

        if use_conv:
            adj = adj_ref[...]                      # bf16, resident for all layers
        h = x_ref[...]                              # bf16 [N, Pin_0]

        for i in range(num_layers):                 # statically unrolled (small L)
            w = w_refs[i][...]                      # bf16 [Pin_i, Pout_i]
            if use_conv and pdims[i] < pdims[i + 1]:
                # Propagate at the narrower input width, then project.
                t = jnp.dot(adj, h, preferred_element_type=jnp.float32)
                y = jnp.dot(t.astype(jnp.bfloat16), w,
                            preferred_element_type=jnp.float32)
            else:
                y = jnp.dot(h, w, preferred_element_type=jnp.float32)
                if use_conv:
                    y = jnp.dot(adj, y.astype(jnp.bfloat16),
                                preferred_element_type=jnp.float32)

            if i < num_layers - 1:
                # Hidden-layer bias omitted: BN(affine=False, batch stats)
                # cancels any per-channel constant added before it exactly.
                mean = jnp.mean(y, axis=0, keepdims=True)          # f32
                var = jnp.mean((y - mean) * (y - mean), axis=0, keepdims=True)
                y = (y - mean) * jax.lax.rsqrt(var + BN_EPS)
                y = jnp.maximum(y, 0.0)             # ReLU; dropout = identity
                h = y.astype(jnp.bfloat16)          # bf16 inter-layer carry
            else:
                o_ref[...] = y + b_ref[...]         # final bias, f32 output

    return kernel


def _full_spec(shape):
    # Full-array block (block shape == array shape satisfies layout constraints).
    return pl.BlockSpec(shape, lambda: (0,) * len(shape))


def _round_up(v, m):
    return ((v + m - 1) // m) * m


def _vmem_limit_bytes(args, out_bytes):
    # Inputs are double-buffered by the pipeline; add generous headroom for
    # intermediates, then cap by (a fraction of) physical VMEM.
    need = 2 * sum(a.size * a.dtype.itemsize for a in args) + 4 * out_bytes
    need += 8 << 20
    try:
        cap = int(pltpu.get_tpu_info().vmem_capacity_bytes * 7 // 8)
    except Exception:  # pragma: no cover - conservative fallback (v7x-safe)
        cap = 56 << 20
    return int(max(32 << 20, min(need, cap)))


# ------------------------------ Model wrapper --------------------------------


def xavier_uniform(key, out_features, in_features, gain):
    # Matches torch.nn.init.xavier_uniform_ on a (out, in) weight.
    bound = gain * math.sqrt(6.0 / (in_features + out_features))
    return jax.random.uniform(
        key, (out_features, in_features), jnp.float32, minval=-bound, maxval=bound
    )


def init_params(key, in_channels, hidden_channels, out_channels, num_layers):
    dims = [in_channels] + [hidden_channels] * (num_layers - 1) + [out_channels]
    params = []
    for i in range(num_layers):
        key, sub = jax.random.split(key)
        w = xavier_uniform(sub, dims[i + 1], dims[i], gain=1.414)   # [out, in]
        b = jnp.zeros((dims[i + 1],), jnp.float32)
        params.append((w, b))
    return params


def build_gcn_adj(edge_index, num_nodes):
    # Dense D^{-1/2} A^T D^{-1/2} matching the PMLP repo gcn_conv
    # (degree over edge_index[1]; 1/sqrt(0) -> 0 like nan_to_num).
    row, col = edge_index[0], edge_index[1]
    deg = jnp.zeros((num_nodes,), jnp.float32).at[col].add(1.0)
    d_inv_sqrt = jnp.where(deg > 0, 1.0 / jnp.sqrt(deg), 0.0)
    vals = d_inv_sqrt[col] * d_inv_sqrt[row]
    adj = jnp.zeros((num_nodes, num_nodes), jnp.float32).at[col, row].add(vals)
    return adj


def pmlp_gcn_forward(x, edge_index, params, use_conv=True,
                     adj_dtype=jnp.bfloat16):
    """params: list of (W [out, in], b [out]) in torch layout.

    adj_dtype: bf16 halves adj DMA/VMEM; pass jnp.float32 if the 1/sqrt(deg)
    coefficients need full precision for very high-degree graphs.
    """
    n, in_channels = x.shape
    num_layers = len(params)

    # Per-layer padded widths (each dim rounded to its OWN multiple of 128).
    dims = [in_channels] + [w.shape[0] for w, _ in params]
    pdims = [_round_up(d, LANE) for d in dims]
    out_channels = dims[-1]

    x_pad = jnp.pad(x.astype(jnp.float32),
                    ((0, 0), (0, pdims[0] - dims[0]))).astype(jnp.bfloat16)

    w_list = []
    for i, (w, _) in enumerate(params):
        wt = jnp.transpose(w).astype(jnp.float32)                   # W^T: [in, out]
        wt = jnp.pad(wt, ((0, pdims[i] - dims[i]),
                          (0, pdims[i + 1] - dims[i + 1])))
        w_list.append(wt.astype(jnp.bfloat16))                      # bf16 DMA

    # Only the FINAL bias is needed (hidden biases are cancelled by BN).
    b_last = jnp.pad(params[-1][1].astype(jnp.float32),
                     (0, pdims[-1] - dims[-1]))[None, :]             # [1, Pout_last]

    args = [x_pad]
    specs = [_full_spec(x_pad.shape)]
    if use_conv:
        adj = build_gcn_adj(edge_index, n).astype(adj_dtype)         # [N, N]
        args.append(adj)
        specs.append(_full_spec(adj.shape))
    for w in w_list:
        args.append(w)
        specs.append(_full_spec(w.shape))
    args.append(b_last)
    specs.append(_full_spec(b_last.shape))

    out_shape = jax.ShapeDtypeStruct((n, pdims[-1]), jnp.float32)
    vmem_limit = _vmem_limit_bytes(args, n * pdims[-1] * 4)

    kernel = _make_kernel(num_layers, use_conv, tuple(pdims))

    out_pad = pl.pallas_call(
        kernel,
        out_shape=out_shape,
        in_specs=specs,
        out_specs=_full_spec((n, pdims[-1])),
        compiler_params=pltpu.CompilerParams(vmem_limit_bytes=vmem_limit),
    )(*args)

    return out_pad[:, :out_channels]


# Pure-JAX f32 reference (for correctness checking only).
def pmlp_gcn_reference(x, edge_index, params, use_conv=True):
    adj = build_gcn_adj(edge_index, x.shape[0])
    num_layers = len(params)
    h = x.astype(jnp.float32)
    for i, (w, b) in enumerate(params):
        h = h @ jnp.transpose(w)
        if use_conv:
            h = adj @ h
        h = h + b[None, :]
        if i < num_layers - 1:
            mean = jnp.mean(h, axis=0, keepdims=True)
            var = jnp.mean((h - mean) ** 2, axis=0, keepdims=True)
            h = (h - mean) / jnp.sqrt(var + BN_EPS)
            h = jnp.maximum(h, 0.0)
    return h


# ---------------------------------- Main --------------------------------------


if __name__ == "__main__":
    # args equivalent: dropout=0.5 (inactive at inference), num_layers=3
    num_nodes = 64
    in_channels = 16
    hidden_channels = 32
    out_channels = 8
    num_layers = 3

    key = jax.random.PRNGKey(0)
    k_x, k_e, k_p = jax.random.split(key, 3)

    x = jax.random.normal(k_x, (num_nodes, in_channels), jnp.float32)
    # deterministic random graph: 256 directed edges over 64 nodes
    edge_index = jax.random.randint(k_e, (2, 256), 0, num_nodes, jnp.int32)

    params = init_params(k_p, in_channels, hidden_channels, out_channels, num_layers)

    # use_conv=True path (GCN propagation resident in VMEM across all layers)
    out = pmlp_gcn_forward(x, edge_index, params, use_conv=True)
    out = jax.block_until_ready(out)
    assert out.shape == (num_nodes, out_channels)
    assert bool(jnp.all(jnp.isfinite(out)))
    ref = pmlp_gcn_reference(x, edge_index, params, use_conv=True)
    # Loose tolerance: kernel uses bf16 MXU inputs with f32 accumulation.
    assert bool(jnp.allclose(out, ref, rtol=5e-2, atol=1e-1)), float(
        jnp.max(jnp.abs(out - ref)))

    # use_conv=False path (adj is never built / DMA'd)
    out_nc = pmlp_gcn_forward(x, edge_index, params, use_conv=False)
    out_nc = jax.block_until_ready(out_nc)
    ref_nc = pmlp_gcn_reference(x, edge_index, params, use_conv=False)
    assert bool(jnp.allclose(out_nc, ref_nc, rtol=5e-2, atol=1e-1)), float(
        jnp.max(jnp.abs(out_nc - ref_nc)))

    print("KERNEL_OK")
</pallas_src>

<mosaic_0001>
module attributes {stable_mosaic.version = 11 : i64} {
  func.func @kernel(%arg0: memref<64x128xbf16, #tpu.memory_space<vmem>>, %arg1: memref<64x64xbf16, #tpu.memory_space<vmem>>, %arg2: memref<128x128xbf16, #tpu.memory_space<vmem>>, %arg3: memref<128x128xbf16, #tpu.memory_space<vmem>>, %arg4: memref<128x128xbf16, #tpu.memory_space<vmem>>, %arg5: memref<1x128xf32, #tpu.memory_space<vmem>>, %arg6: memref<64x128xf32, #tpu.memory_space<vmem>>) attributes {dimension_semantics = [], scalar_prefetch = 0 : i64, scratch_operands = 0 : i64, tpu.core_type = #tpu.core_type<tc>} {
    %c0 = arith.constant 0 : index
    %c0_0 = arith.constant 0 : index
    %0 = vector.load %arg1[%c0, %c0_0] : memref<64x64xbf16, #tpu.memory_space<vmem>>, vector<64x64xbf16>
    %c0_1 = arith.constant 0 : index
    %c0_2 = arith.constant 0 : index
    %1 = vector.load %arg0[%c0_1, %c0_2] : memref<64x128xbf16, #tpu.memory_space<vmem>>, vector<64x128xbf16>
    %c0_3 = arith.constant 0 : index
    %c0_4 = arith.constant 0 : index
    %2 = vector.load %arg2[%c0_3, %c0_4] : memref<128x128xbf16, #tpu.memory_space<vmem>>, vector<128x128xbf16>
    %cst = arith.constant dense<0.000000e+00> : vector<64x128xf32>
    %3 = tpu.matmul %1, %2, %cst {dimension_numbers = #tpu.dot_dimension_numbers<[1], [0], [0], [1], [0, 0, 1, 1], [], []>} : vector<64x128xbf16>, vector<128x128xbf16>, vector<64x128xf32> -> vector<64x128xf32>
    %4 = arith.truncf %3 : vector<64x128xf32> to vector<64x128xbf16>
    %cst_5 = arith.constant dense<0.000000e+00> : vector<64x128xf32>
    %5 = tpu.matmul %0, %4, %cst_5 {dimension_numbers = #tpu.dot_dimension_numbers<[1], [0], [0], [1], [0, 0, 1, 1], [], []>} : vector<64x64xbf16>, vector<64x128xbf16>, vector<64x128xf32> -> vector<64x128xf32>
    %cst_6 = arith.constant dense<0.000000e+00> : vector<128xf32>
    %6 = vector.multi_reduction <add>, %5, %cst_6 [0] : vector<64x128xf32> to vector<128xf32>
    %7 = vector.shape_cast %6 : vector<128xf32> to vector<1x128xf32>
    %cst_7 = arith.constant 6.400000e+01 : f32
    %8 = vector.broadcast %cst_7 : f32 to vector<1x128xf32>
    %9 = arith.divf %7, %8 : vector<1x128xf32>
    %10 = vector.broadcast %9 : vector<1x128xf32> to vector<64x128xf32>
    %11 = arith.subf %5, %10 : vector<64x128xf32>
    %12 = vector.broadcast %9 : vector<1x128xf32> to vector<64x128xf32>
    %13 = arith.subf %5, %12 : vector<64x128xf32>
    %14 = arith.mulf %11, %13 : vector<64x128xf32>
    %cst_8 = arith.constant dense<0.000000e+00> : vector<128xf32>
    %15 = vector.multi_reduction <add>, %14, %cst_8 [0] : vector<64x128xf32> to vector<128xf32>
    %16 = vector.shape_cast %15 : vector<128xf32> to vector<1x128xf32>
    %cst_9 = arith.constant 6.400000e+01 : f32
    %17 = vector.broadcast %cst_9 : f32 to vector<1x128xf32>
    %18 = arith.divf %16, %17 : vector<1x128xf32>
    %19 = vector.broadcast %9 : vector<1x128xf32> to vector<64x128xf32>
    %20 = arith.subf %5, %19 : vector<64x128xf32>
    %cst_10 = arith.constant 9.99999974E-6 : f32
    %21 = vector.broadcast %cst_10 : f32 to vector<1x128xf32>
    %22 = arith.addf %18, %21 : vector<1x128xf32>
    %23 = math.rsqrt %22 : vector<1x128xf32>
    %24 = vector.broadcast %23 : vector<1x128xf32> to vector<64x128xf32>
    %25 = arith.mulf %20, %24 : vector<64x128xf32>
    %cst_11 = arith.constant 0.000000e+00 : f32
    %26 = vector.broadcast %cst_11 : f32 to vector<64x128xf32>
    %27 = arith.maximumf %25, %26 : vector<64x128xf32>
    %28 = arith.truncf %27 : vector<64x128xf32> to vector<64x128xbf16>
    %c0_12 = arith.constant 0 : index
    %c0_13 = arith.constant 0 : index
    %29 = vector.load %arg3[%c0_12, %c0_13] : memref<128x128xbf16, #tpu.memory_space<vmem>>, vector<128x128xbf16>
    %cst_14 = arith.constant dense<0.000000e+00> : vector<64x128xf32>
    %30 = tpu.matmul %28, %29, %cst_14 {dimension_numbers = #tpu.dot_dimension_numbers<[1], [0], [0], [1], [0, 0, 1, 1], [], []>} : vector<64x128xbf16>, vector<128x128xbf16>, vector<64x128xf32> -> vector<64x128xf32>
    %31 = arith.truncf %30 : vector<64x128xf32> to vector<64x128xbf16>
    %cst_15 = arith.constant dense<0.000000e+00> : vector<64x128xf32>
    %32 = tpu.matmul %0, %31, %cst_15 {dimension_numbers = #tpu.dot_dimension_numbers<[1], [0], [0], [1], [0, 0, 1, 1], [], []>} : vector<64x64xbf16>, vector<64x128xbf16>, vector<64x128xf32> -> vector<64x128xf32>
    %cst_16 = arith.constant dense<0.000000e+00> : vector<128xf32>
    %33 = vector.multi_reduction <add>, %32, %cst_16 [0] : vector<64x128xf32> to vector<128xf32>
    %34 = vector.shape_cast %33 : vector<128xf32> to vector<1x128xf32>
    %cst_17 = arith.constant 6.400000e+01 : f32
    %35 = vector.broadcast %cst_17 : f32 to vector<1x128xf32>
    %36 = arith.divf %34, %35 : vector<1x128xf32>
    %37 = vector.broadcast %36 : vector<1x128xf32> to vector<64x128xf32>
    %38 = arith.subf %32, %37 : vector<64x128xf32>
    %39 = vector.broadcast %36 : vector<1x128xf32> to vector<64x128xf32>
    %40 = arith.subf %32, %39 : vector<64x128xf32>
    %41 = arith.mulf %38, %40 : vector<64x128xf32>
    %cst_18 = arith.constant dense<0.000000e+00> : vector<128xf32>
    %42 = vector.multi_reduction <add>, %41, %cst_18 [0] : vector<64x128xf32> to vector<128xf32>
    %43 = vector.shape_cast %42 : vector<128xf32> to vector<1x128xf32>
    %cst_19 = arith.constant 6.400000e+01 : f32
    %44 = vector.broadcast %cst_19 : f32 to vector<1x128xf32>
    %45 = arith.divf %43, %44 : vector<1x128xf32>
    %46 = vector.broadcast %36 : vector<1x128xf32> to vector<64x128xf32>
    %47 = arith.subf %32, %46 : vector<64x128xf32>
    %cst_20 = arith.constant 9.99999974E-6 : f32
    %48 = vector.broadcast %cst_20 : f32 to vector<1x128xf32>
    %49 = arith.addf %45, %48 : vector<1x128xf32>
    %50 = math.rsqrt %49 : vector<1x128xf32>
    %51 = vector.broadcast %50 : vector<1x128xf32> to vector<64x128xf32>
    %52 = arith.mulf %47, %51 : vector<64x128xf32>
    %cst_21 = arith.constant 0.000000e+00 : f32
    %53 = vector.broadcast %cst_21 : f32 to vector<64x128xf32>
    %54 = arith.maximumf %52, %53 : vector<64x128xf32>
    %55 = arith.truncf %54 : vector<64x128xf32> to vector<64x128xbf16>
    %c0_22 = arith.constant 0 : index
    %c0_23 = arith.constant 0 : index
    %56 = vector.load %arg4[%c0_22, %c0_23] : memref<128x128xbf16, #tpu.memory_space<vmem>>, vector<128x128xbf16>
    %cst_24 = arith.constant dense<0.000000e+00> : vector<64x128xf32>
    %57 = tpu.matmul %55, %56, %cst_24 {dimension_numbers = #tpu.dot_dimension_numbers<[1], [0], [0], [1], [0, 0, 1, 1], [], []>} : vector<64x128xbf16>, vector<128x128xbf16>, vector<64x128xf32> -> vector<64x128xf32>
    %58 = arith.truncf %57 : vector<64x128xf32> to vector<64x128xbf16>
    %cst_25 = arith.constant dense<0.000000e+00> : vector<64x128xf32>
    %59 = tpu.matmul %0, %58, %cst_25 {dimension_numbers = #tpu.dot_dimension_numbers<[1], [0], [0], [1], [0, 0, 1, 1], [], []>} : vector<64x64xbf16>, vector<64x128xbf16>, vector<64x128xf32> -> vector<64x128xf32>
    %c0_26 = arith.constant 0 : index
    %c0_27 = arith.constant 0 : index
    %60 = vector.load %arg5[%c0_26, %c0_27] : memref<1x128xf32, #tpu.memory_space<vmem>>, vector<1x128xf32>
    %61 = vector.broadcast %60 : vector<1x128xf32> to vector<64x128xf32>
    %62 = arith.addf %59, %61 : vector<64x128xf32>
    %c0_28 = arith.constant 0 : index
    %c0_29 = arith.constant 0 : index
    %63 = vector.load %arg6[%c0_28, %c0_29] : memref<64x128xf32, #tpu.memory_space<vmem>>, vector<64x128xf32>
    tpu.vector_store %arg6[%c0_28, %c0_29], %62 {strides = array<i32>} : memref<64x128xf32, #tpu.memory_space<vmem>>, vector<64x128xf32>,
    return
  }
}

</mosaic_0001>

<bundles_post_ra>
// kernel: tpu_custom_call.1
= control target key start
LH: loop header
LB: loop body
LE: loop exit
PB: predicated region body
PF: predicated region fallthrough
CT: control target
= control target key end

     0   :  { %11 = vsyncpa [#allocation3], 0  ;;  %s1219_s0 = inlined_call_operand.hbm [shape: bf16[64,128], index: 0, kind: input, shape index: {}]   ;;  %s1220_s1 = inlined_call_operand.hbm [shape: bf16[64,64], index: 1, kind: input, shape index: {}]   ;;  %s1221_s2 = inlined_call_operand.hbm [shape: bf16[128,128], index: 2, kind: input, shape index: {}]   ;;  %s1222_s3 = inlined_call_operand.hbm [shape: bf16[128,128], index: 3, kind: input, shape index: {}]   ;;  %s1223_s4 = inlined_call_operand.hbm [shape: bf16[128,128], index: 4, kind: input, shape index: {}]   ;;  %s1224_s5 = inlined_call_operand.vmem [shape: f32[1,128], index: 5, kind: input, shape index: {}]   ;;  %s1225_s6 = inlined_call_operand.hbm [shape: f32[64,128], index: 6, kind: output, shape index: {}]  }
   0x1   :  { %12 = vsyncpa [#allocation6], 0 }
   0x2   :  { %13 = vsyncpa [#allocation9], 0 }
   0x3   :  { %14 = vsyncpa [#allocation4], 0  ;;  %s32_s23 = sshll.u32 %s1220_s1, 4  ;;  %s1094_s24 = smov [#allocation5]   ;;  %s33_s23 = int_to_ptr.hbm [resolvable:$true] %s32_s23 }
   0x4   :  { %s34_s25 = sshll.u32 %s1094_s24, 4  ;;  %s58_s28 = sshll.u32 %s1222_s3, 4  ;;  %s35_s25 = int_to_ptr.vmem [resolvable:$true] %s34_s25  ;;  %s59_s28 = int_to_ptr.hbm [resolvable:$true] %s58_s28 }
   0x5   :  { %s1095_s29 = smov 64   ;;  %s1096_s30 = smov 4  }
   0x6   :  { %40 = dma.hbm_to_vmem [thread:$0]  %s33_s23, 512, %s35_s25, [#allocation6], %s1095_s29, %s1095_s29, %s1096_s30  }
   0x7   :  { %s1097_s7 = smov [#allocation8]   ;;  %s19_s11 = sshll.u32 %s1219_s0, 4  ;;  %s20_s11 = int_to_ptr.hbm [resolvable:$true] %s19_s11 }
   0x8   :  { %s60_s8 = sshll.u32 %s1097_s7, 4  ;;  %s45_s13 = sshll.u32 %s1221_s2, 4  ;;  %s61_s8 = int_to_ptr.vmem [resolvable:$true] %s60_s8  ;;  %s46_s13 = int_to_ptr.hbm [resolvable:$true] %s45_s13 }
   0x9   :  { %66 = dma.hbm_to_vmem [thread:$0]  %s59_s28, 1024, %s61_s8, [#allocation9], %s1095_s29, %s1095_s29, %s1096_s30  }
   0xa   :  { %s1098_s14 = smov [#allocation2]   ;;  %s1099_s3 = smov [#allocation7]  }
   0xb   :  { %s21_s15 = sshll.u32 %s1098_s14, 4  ;;  %s47_s16 = sshll.u32 %s1099_s3, 4  ;;  %s22_s15 = int_to_ptr.vmem [resolvable:$true] %s21_s15  ;;  %s48_s16 = int_to_ptr.vmem [resolvable:$true] %s47_s16 }
   0xc   :  { %27 = dma.hbm_to_vmem [thread:$0]  %s20_s11, 512, %s22_s15, [#allocation3], %s1095_s29, %s1095_s29, %s1096_s30  }
   0xd   :  { %s71_s19 = sshll.u32 %s1223_s4, 4  ;;  %s1100_s0 = smov [#allocation10]   ;;  %s72_s19 = int_to_ptr.hbm [resolvable:$true] %s71_s19 }
   0xe   :  { %53 = dma.hbm_to_vmem [thread:$0]  %s46_s13, 1024, %s48_s16, [#allocation6], %s1095_s29, %s1095_s29, %s1096_s30  }
   0xf   :  { %s73_s20 = sshll.u32 %s1100_s0, 4  ;;  %s74_s20 = int_to_ptr.vmem [resolvable:$true] %s73_s20 }
  0x10   :  { %79 = dma.hbm_to_vmem [thread:$0]  %s72_s19, 1024, %s74_s20, [#allocation9], %s1095_s29, %s1095_s29, %s1096_s30  }
  0x11   :  { %1086 = dma.done.wait [#allocation3], 512  }
  0x12   :  { %1087 = vsyncadd [#allocation3], 4294966784 }
  0x13   :  { %1088 = dma.done.wait [#allocation6], 1536  }
  0x14   :  { %1089 = vsyncadd [#allocation6], 4294965760 }
  0x15   :  { %1090 = dma.done.wait [#allocation9], 2048  }
  0x16   :  { %1091 = vsyncadd [#allocation9], 4294965248  ;;  %v899_v0 = vld [vmem:[#allocation7 + $0x38] sm:$0xff]  ;;  %v898_v1 = vld [vmem:[#allocation7 + $0x30] sm:$0xff]  ;;  %vm260_vm0 = vcmask 523264   ;;  %v1101_v33 = vmov 64.0  }
  0x17   :  { %207 = vmatpush.bf16.msra.mxu0 %v899_v0  ;;  %v897_v2 = vld [vmem:[#allocation7 + $0x28] sm:$0xff]  ;;  %v896_v3 = vld [vmem:[#allocation7 + $0x20] sm:$0xff]  ;;  %v895_v4 = vld [vmem:[#allocation7 + $0x18] sm:$0xff]  ;;  %936 = vrcp.f32 %v1101_v33  ;;  %s729_s24 = sshll.u32 %s1225_s6, 4  ;;  %s1103_s25 = smov 128   ;;  %s730_s24 = int_to_ptr.hbm [resolvable:$true] %s729_s24 }
  0x18   :  { %v894_v5 = vld [vmem:[#allocation7 + $0x10] sm:$0xff]  ;;  %v893_v6 = vld [vmem:[#allocation7 + $0x8] sm:$0xff]  ;;  %v892_v7 = vld [vmem:[#allocation7] sm:$0xff]  ;;  %s1104_s26 = smov 8  }
  0x19   :  { %v888_v8 = vld [vmem:[#allocation2] sm:$0xff]  ;;  %v889_v9 = vld [vmem:[#allocation2 + $0x8] sm:$0xff]  ;;  %v890_v10 = vld [vmem:[#allocation2 + $0x10] sm:$0xff] }
  0x1a   :  { %v891_v11 = vld [vmem:[#allocation2 + $0x18] sm:$0xff]  ;;  %v1155_v24 = vld [vmem:[#allocation5] sm:$0xff]  ;;  %v1157_v25 = vld [vmem:[#allocation5 + $0x10] sm:$0xff] }
  0x1b   :  { %208 = vmatpush.bf16.msra.mxu0 %v898_v1  ;;  %v1163_v26 = vld [vmem:[#allocation5 + $0x8] sm:$0xff]  ;;  %v1165_v27 = vld [vmem:[#allocation5 + $0x18] sm:$0xff]  ;;  %v906_v58 = vld [vmem:[#allocation8 + $0x30] sm:$0xff] }
  0x1c   :  { %v907_v54 = vld [vmem:[#allocation8 + $0x38] sm:$0xff]  ;;  %v905_v1 = vld [vmem:[#allocation8 + $0x28] sm:$0xff] }
  0x1d   :  { %v937_v38 = vpop.eup %936  ;;  %448 = vmatpush.bf16.msra.mxu2 %v907_v54 }
  0x1e   :  { %v316_v41 = vmul.f32 64.0, %v937_v38  ;;  %vm320_vm1 = vweird.f32 %v937_v38 }
  0x1f   :  { %209 = vmatpush.bf16.msra.mxu0 %v897_v2 }
  0x20   :  { %v317_v45 = vsub.f32 1.0, %v316_v41 }
  0x21   :  { %449 = vmatpush.bf16.msra.mxu2 %v906_v58 }
  0x22   :  { %v318_v48 = vmul.f32 %v937_v38, %v317_v45 }
  0x23   :  { %210 = vmatpush.bf16.msra.mxu0 %v896_v3 }
  0x24   :  { %v319_v51 = vadd.f32 %v937_v38, %v318_v48 }
  0x25   :  { %450 = vmatpush.bf16.msra.mxu2 %v905_v1 }
  0x26   :  { %v1171_v55 = vsel %vm320_vm1, %v937_v38, %v319_v51 }
  0x27   :  { %211 = vmatpush.bf16.msra.mxu0 %v895_v4 }
  0x2b   :  { %212 = vmatpush.bf16.msra.mxu0 %v894_v5 }
  0x2f   :  { %213 = vmatpush.bf16.msra.mxu0 %v893_v6 }
  0x33   :  { %214 = vmatpush.bf16.msra.mxu0 %v892_v7 }
  0x36   :  { %215 = vmatmul.bf16.vlgmr.msra.gmra.mxu0 %v888_v8  ;;  %v904_v8 = vld [vmem:[#allocation8 + $0x20] sm:$0xff] }
  0x37   :  { %451 = vmatpush.bf16.msra.mxu2 %v904_v8 }
  0x46   :  { %220 = vmatmul.bf16.gmra.mxu0 %v889_v9 }
  0x56   :  { %225 = vmatmul.bf16.gmra.mxu0 %v890_v10 }
  0x66   :  { %230 = vmatmul.bf16.gmra.mxu0 %v891_v11 }
  0xb3   :  { %v216_v12 = vpop.f32.mrf.mxu0 }
  0xbb   :  { %v218_v13 = vpop.f32.mrf.mxu0 }
  0xbc   :  { %v236_v23 = vpack.c.bf16 %v218_v13, %v216_v12 }
  0xc3   :  { %v221_v14 = vpop.f32.mrf.mxu0 }
  0xcb   :  { %v223_v15 = vpop.f32.mrf.mxu0 }
  0xcc   :  { %v237_v22 = vpack.c.bf16 %v223_v15, %v221_v14  ;;  %v903_v15 = vld [vmem:[#allocation8 + $0x18] sm:$0xff] }
  0xcd   :  { %452 = vmatpush.bf16.msra.mxu2 %v903_v15 }
  0xd3   :  { %v226_v16 = vpop.f32.mrf.mxu0 }
  0xdb   :  { %v228_v17 = vpop.f32.mrf.mxu0 }
  0xdc   :  { %v238_v21 = vpack.c.bf16 %v228_v17, %v226_v16 }
  0xe3   :  { %v231_v18 = vpop.f32.mrf.mxu0 }
  0xeb   :  { %v233_v19 = vpop.f32.mrf.mxu0 }
  0xec   :  { %v239_v20 = vpack.c.bf16 %v233_v19, %v231_v18 }
  0xee   :  { %277 = vmatpush.bf16.msrb.mxu0 %v239_v20  ;;  %916 = vmatpush.bf16.msra.mxu1 %v239_v20  ;;  %v902_v20 = vld [vmem:[#allocation8 + $0x10] sm:$0xff] }
  0xef   :  { %453 = vmatpush.bf16.msra.mxu2 %v902_v20 }
  0xf2   :  { %278 = vmatpush.bf16.msrb.mxu0 %v238_v21  ;;  %917 = vmatpush.bf16.msra.mxu1 %v238_v21 }
  0xf6   :  { %279 = vmatpush.bf16.msrb.mxu0 %v237_v22  ;;  %918 = vmatpush.bf16.msra.mxu1 %v237_v22 }
  0xfa   :  { %280 = vmatpush.bf16.msrb.mxu0 %v236_v23  ;;  %919 = vmatpush.bf16.msra.mxu1 %v236_v23  ;;  %v901_v23 = vld [vmem:[#allocation8 + $0x8] sm:$0xff] }
  0xfb   :  { %454 = vmatpush.bf16.msra.mxu2 %v901_v23 }
  0xfd   :  { %808 = vmatmul.msk.bf16.vlgmr.msrb.gmra.mxu0 %vm260_vm0, %v1155_v24  ;;  %810 = vmatmul.msk.bf16.vlgmr.msra.gmra.mxu1 %vm260_vm0, %v1157_v25 }
 0x10d   :  { %809 = vmatmul.msk.bf16.gmra.mxu0 %vm260_vm0, %v1163_v26  ;;  %811 = vmatmul.msk.bf16.gmra.mxu1 %vm260_vm0, %v1165_v27 }
 0x17a   :  { %v282_v28 = vpop.f32.mrf.mxu0  ;;  %v292_v29 = vpop.f32.mrf.mxu1 }
 0x182   :  { %v284_v30 = vpop.f32.mrf.mxu0  ;;  %v294_v31 = vpop.f32.mrf.mxu1 }
 0x183   :  { %v302_v34 = vadd.f32 %v284_v30, %v282_v28 }
 0x18a   :  { %v287_v32 = vpop.f32.mrf.mxu0  ;;  %v297_v35 = vpop.f32.mrf.mxu1 }
 0x18b   :  { %v303_v36 = vadd.f32 %v302_v34, %v287_v32 }
 0x192   :  { %v289_v37 = vpop.f32.mrf.mxu0  ;;  %v299_v44 = vpop.f32.mrf.mxu1 }
 0x193   :  { %v304_v39 = vadd.f32 %v303_v36, %v289_v37 }
 0x195   :  { %v305_v40 = vadd.f32 %v304_v39, %v292_v29 }
 0x197   :  { %v306_v42 = vadd.f32 %v305_v40, %v294_v31 }
 0x199   :  { %v307_v43 = vadd.f32 %v306_v42, %v297_v35 }
 0x19b   :  { %v308_v46 = vadd.f32 %v307_v43, %v299_v44 }
 0x19d   :  { %v309_v47 = vrot.slane %v308_v46, 4 }
 0x19f   :  { %v310_v49 = vadd.f32 %v309_v47, %v308_v46 }
 0x1a1   :  { %v311_v50 = vrot.slane %v310_v49, 2 }
 0x1a3   :  { %v312_v52 = vadd.f32 %v311_v50, %v310_v49 }
 0x1a5   :  { %v313_v53 = vrot.slane %v312_v52, 1 }
 0x1a7   :  { %v314_v56 = vadd.f32 %v313_v53, %v312_v52 }
 0x1a9   :  { %v322_v57 = vmul.f32 %v1171_v55, %v314_v56 }
 0x1ab   :  { %v323_v59 = vsub.f32 %v282_v28, %v322_v57  ;;  %v324_v60 = vsub.f32 %v284_v30, %v322_v57  ;;  %v1174_v61 = vsub.f32 %v287_v32, %v322_v57  ;;  %v1176_v62 = vsub.f32 %v289_v37, %v322_v57 }
 0x1ac   :  { %v327_v2 = vsub.f32 %v292_v29, %v322_v57  ;;  %v328_v5 = vsub.f32 %v294_v31, %v322_v57  ;;  %v329_v9 = vsub.f32 %v297_v35, %v322_v57  ;;  %v330_v12 = vsub.f32 %v299_v44, %v322_v57  ;;  %v900_v29 = vld [vmem:[#allocation8] sm:$0xff] }
 0x1ad   :  { %v331_v63 = vmul.f32 %v323_v59, %v323_v59  ;;  %v332_v0 = vmul.f32 %v324_v60, %v324_v60  ;;  %v333_v3 = vmul.f32 %v1174_v61, %v1174_v61  ;;  %v334_v6 = vmul.f32 %v1176_v62, %v1176_v62  ;;  %455 = vmatpush.bf16.msra.mxu2 %v900_v29 }
 0x1ae   :  { %v335_v10 = vmul.f32 %v327_v2, %v327_v2  ;;  %v336_v13 = vmul.f32 %v328_v5, %v328_v5  ;;  %v337_v16 = vmul.f32 %v329_v9, %v329_v9  ;;  %v338_v18 = vmul.f32 %v330_v12, %v330_v12 }
 0x1af   :  { %v339_v4 = vadd.f32 %v332_v0, %v331_v63 }
 0x1b1   :  { %v340_v7 = vadd.f32 %v339_v4, %v333_v3 }
 0x1b3   :  { %v341_v11 = vadd.f32 %v340_v7, %v334_v6 }
 0x1b5   :  { %v342_v14 = vadd.f32 %v341_v11, %v335_v10 }
 0x1b7   :  { %v343_v17 = vadd.f32 %v342_v14, %v336_v13 }
 0x1b9   :  { %v344_v19 = vadd.f32 %v343_v17, %v337_v16 }
 0x1bb   :  { %v345_v21 = vadd.f32 %v344_v19, %v338_v18 }
 0x1bd   :  { %v346_v22 = vrot.slane %v345_v21, 4 }
 0x1bf   :  { %v347_v28 = vadd.f32 %v346_v22, %v345_v21 }
 0x1c1   :  { %v348_v30 = vrot.slane %v347_v28, 2 }
 0x1c3   :  { %v349_v31 = vadd.f32 %v348_v30, %v347_v28 }
 0x1c5   :  { %v350_v32 = vrot.slane %v349_v31, 1 }
 0x1c7   :  { %v351_v33 = vadd.f32 %v350_v32, %v349_v31 }
 0x1c9   :  { %v352_v34 = vmul.f32 %v351_v33, %v1171_v55 }
 0x1cb   :  { %v353_v35 = vadd.f32 1e-05, %v352_v34 }
 0x1cd   :  { %938 = vrsqrt.f32 %v353_v35  ;;  %vm360_vm3 = vweird.f32 %v353_v35 }
 0x1d3   :  { %v939_v36 = vpop.eup %938 }
 0x1d4   :  { %v355_v37 = vmul.f32 %v939_v36, %v353_v35  ;;  %vm361_vm2 = vweird.f32 %v939_v36 }
 0x1d5   :  { %vm362_vm4 = vmor %vm360_vm3, %vm361_vm2 }
 0x1d6   :  { %v356_v38 = vmul.f32 %v939_v36, %v355_v37 }
 0x1d8   :  { %v357_v39 = vmul.f32 0.5, %v356_v38 }
 0x1da   :  { %v358_v40 = vsub.f32 1.5, %v357_v39  ;;  %v914_v39 = vld [vmem:[#allocation10 + $0x30] sm:$0xff] }
 0x1dc   :  { %v359_v41 = vmul.f32 %v939_v36, %v358_v40 }
 0x1de   :  { %v363_v42 = vsel %vm362_vm4, %v939_v36, %v359_v41  ;;  %v915_v36 = vld [vmem:[#allocation10 + $0x38] sm:$0xff] }
 0x1df   :  { %v371_v43 = vmul.f32 %v363_v42, %v330_v12  ;;  %v364_v44 = vmul.f32 %v363_v42, %v323_v59  ;;  %v365_v45 = vmul.f32 %v363_v42, %v324_v60  ;;  %v368_v46 = vmul.f32 %v363_v42, %v327_v2  ;;  %649 = vmatpush.bf16.msrb.mxu1 %v915_v36 }
 0x1e0   :  { %v369_v47 = vmul.f32 %v363_v42, %v328_v5  ;;  %v370_v48 = vmul.f32 %v363_v42, %v329_v9  ;;  %v366_v63 = vmul.f32 %v363_v42, %v1174_v61  ;;  %v367_v0 = vmul.f32 %v363_v42, %v1176_v62 }
 0x1e1   :  { %v372_v49 = vmax.f32 %v364_v44, 0.0  ;;  %v373_v50 = vmax.f32 %v365_v45, 0.0  ;;  %v379_v51 = vmax.f32 %v371_v43, 0.0  ;;  %v376_v52 = vmax.f32 %v368_v46, 0.0  ;;  %v913_v46 = vld [vmem:[#allocation10 + $0x28] sm:$0xff] }
 0x1e2   :  { %v377_v53 = vmax.f32 %v369_v47, 0.0  ;;  %v378_v54 = vmax.f32 %v370_v48, 0.0  ;;  %v374_v1 = vmax.f32 %v366_v63, 0.0  ;;  %v375_v59 = vmax.f32 %v367_v0, 0.0 }
 0x1e3   :  { %v380_v56 = vpack.c.bf16 %v373_v50, %v372_v49  ;;  %650 = vmatpush.bf16.msrb.mxu1 %v914_v39 }
 0x1e4   :  { %v382_v57 = vpack.c.bf16 %v377_v53, %v376_v52  ;;  %v383_v58 = vpack.c.bf16 %v379_v51, %v378_v54  ;;  %v381_v60 = vpack.c.bf16 %v375_v59, %v374_v1  ;;  %v912_v53 = vld [vmem:[#allocation10 + $0x20] sm:$0xff]  ;;  %v911_v1 = vld [vmem:[#allocation10 + $0x18] sm:$0xff] }
 0x1e5   :  { %456 = vmatmul.bf16.vlgmr.msra.gmra.mxu2 %v380_v56 }
 0x1e7   :  { %651 = vmatpush.bf16.msrb.mxu1 %v913_v46 }
 0x1eb   :  { %652 = vmatpush.bf16.msrb.mxu1 %v912_v53 }
 0x1ef   :  { %653 = vmatpush.bf16.msrb.mxu1 %v911_v1 }
 0x1f5   :  { %461 = vmatmul.bf16.gmra.mxu2 %v381_v60 }
 0x205   :  { %466 = vmatmul.bf16.gmra.mxu2 %v382_v57 }
 0x215   :  { %471 = vmatmul.bf16.gmra.mxu2 %v383_v58 }
 0x268   :  { %v457_v2 = vpop.f32.mrf.mxu2 }
 0x270   :  { %v459_v3 = vpop.f32.mrf.mxu2 }
 0x271   :  { %v477_v11 = vpack.c.bf16 %v459_v3, %v457_v2 }
 0x278   :  { %v462_v4 = vpop.f32.mrf.mxu2 }
 0x280   :  { %v464_v5 = vpop.f32.mrf.mxu2 }
 0x281   :  { %v478_v62 = vpack.c.bf16 %v464_v5, %v462_v4  ;;  %v910_v4 = vld [vmem:[#allocation10 + $0x10] sm:$0xff] }
 0x282   :  { %654 = vmatpush.bf16.msrb.mxu1 %v910_v4 }
 0x288   :  { %v467_v6 = vpop.f32.mrf.mxu2 }
 0x290   :  { %v469_v7 = vpop.f32.mrf.mxu2 }
 0x291   :  { %v479_v61 = vpack.c.bf16 %v469_v7, %v467_v6  ;;  %v909_v7 = vld [vmem:[#allocation10 + $0x8] sm:$0xff] }
 0x292   :  { %655 = vmatpush.bf16.msrb.mxu1 %v909_v7 }
 0x298   :  { %v472_v8 = vpop.f32.mrf.mxu2 }
 0x2a0   :  { %v474_v9 = vpop.f32.mrf.mxu2 }
 0x2a1   :  { %v480_v10 = vpack.c.bf16 %v474_v9, %v472_v8  ;;  %v908_v9 = vld [vmem:[#allocation10] sm:$0xff] }
 0x2a2   :  { %656 = vmatpush.bf16.msrb.mxu1 %v908_v9 }
 0x2a3   :  { %485 = vmatpush.bf16.msrb.mxu2 %v480_v10  ;;  %920 = vmatpush.bf16.msra.mxu3 %v480_v10 }
 0x2a7   :  { %486 = vmatpush.bf16.msrb.mxu2 %v479_v61  ;;  %921 = vmatpush.bf16.msra.mxu3 %v479_v61 }
 0x2ab   :  { %487 = vmatpush.bf16.msrb.mxu2 %v478_v62  ;;  %922 = vmatpush.bf16.msra.mxu3 %v478_v62 }
 0x2af   :  { %488 = vmatpush.bf16.msrb.mxu2 %v477_v11  ;;  %923 = vmatpush.bf16.msra.mxu3 %v477_v11 }
 0x2b2   :  { %845 = vmatmul.msk.bf16.vlgmr.msra.gmra.mxu3 %vm260_vm0, %v1163_v26  ;;  %844 = vmatmul.msk.bf16.vlgmr.msrb.gmra.mxu2 %vm260_vm0, %v1155_v24 }
 0x2c2   :  { %846 = vmatmul.msk.bf16.gmra.mxu3 %vm260_vm0, %v1157_v25 }
 0x2d2   :  { %847 = vmatmul.msk.bf16.gmra.mxu3 %vm260_vm0, %v1165_v27 }
 0x335   :  { %v495_v12 = vpop.f32.mrf.mxu3  ;;  %v490_v14 = vpop.f32.mrf.mxu2 }
 0x33d   :  { %v497_v13 = vpop.f32.mrf.mxu3  ;;  %v492_v16 = vpop.f32.mrf.mxu2 }
 0x33e   :  { %v510_v18 = vadd.f32 %v492_v16, %v490_v14 }
 0x340   :  { %v511_v19 = vadd.f32 %v510_v18, %v495_v12 }
 0x342   :  { %v512_v21 = vadd.f32 %v511_v19, %v497_v13 }
 0x345   :  { %v500_v15 = vpop.f32.mrf.mxu3 }
 0x346   :  { %v513_v22 = vadd.f32 %v512_v21, %v500_v15 }
 0x34d   :  { %v502_v17 = vpop.f32.mrf.mxu3 }
 0x34e   :  { %v514_v23 = vadd.f32 %v513_v22, %v502_v17 }
 0x355   :  { %v505_v20 = vpop.f32.mrf.mxu3 }
 0x356   :  { %v515_v28 = vadd.f32 %v514_v23, %v505_v20 }
 0x35d   :  { %v507_v29 = vpop.f32.mrf.mxu3 }
 0x35e   :  { %v516_v30 = vadd.f32 %v515_v28, %v507_v29 }
 0x360   :  { %v517_v31 = vrot.slane %v516_v30, 4 }
 0x362   :  { %v518_v32 = vadd.f32 %v517_v31, %v516_v30 }
 0x364   :  { %v519_v33 = vrot.slane %v518_v32, 2 }
 0x366   :  { %v520_v34 = vadd.f32 %v519_v33, %v518_v32 }
 0x368   :  { %v521_v35 = vrot.slane %v520_v34, 1 }
 0x36a   :  { %v522_v37 = vadd.f32 %v521_v35, %v520_v34 }
 0x36c   :  { %v523_v38 = vmul.f32 %v522_v37, %v1171_v55 }
 0x36e   :  { %v524_v40 = vsub.f32 %v490_v14, %v523_v38  ;;  %v525_v41 = vsub.f32 %v492_v16, %v523_v38  ;;  %v1194_v42 = vsub.f32 %v495_v12, %v523_v38  ;;  %v1196_v43 = vsub.f32 %v497_v13, %v523_v38 }
 0x36f   :  { %v528_v47 = vsub.f32 %v500_v15, %v523_v38  ;;  %v529_v50 = vsub.f32 %v502_v17, %v523_v38  ;;  %v530_v54 = vsub.f32 %v505_v20, %v523_v38  ;;  %v531_v58 = vsub.f32 %v507_v29, %v523_v38 }
 0x370   :  { %v532_v44 = vmul.f32 %v524_v40, %v524_v40  ;;  %v533_v45 = vmul.f32 %v525_v41, %v525_v41  ;;  %v534_v48 = vmul.f32 %v1194_v42, %v1194_v42  ;;  %v535_v51 = vmul.f32 %v1196_v43, %v1196_v43 }
 0x371   :  { %v536_v56 = vmul.f32 %v528_v47, %v528_v47  ;;  %v537_v63 = vmul.f32 %v529_v50, %v529_v50  ;;  %v538_v59 = vmul.f32 %v530_v54, %v530_v54  ;;  %v539_v2 = vmul.f32 %v531_v58, %v531_v58 }
 0x372   :  { %v540_v49 = vadd.f32 %v533_v45, %v532_v44 }
 0x374   :  { %v541_v52 = vadd.f32 %v540_v49, %v534_v48 }
 0x376   :  { %v542_v57 = vadd.f32 %v541_v52, %v535_v51 }
 0x378   :  { %v543_v0 = vadd.f32 %v542_v57, %v536_v56  ;;  %v935_v57 = vld [vmem:[%s1224_s5] ss:$0 sm:$0xff]  ;;  %s1102_s5 = smov [#allocation11]  }
 0x379   :  { %s727_s21 = sshll.u32 %s1102_s5, 4  ;;  %s728_s21 = int_to_ptr.vmem [resolvable:$true] %s727_s21 }
 0x37a   :  { %v544_v60 = vadd.f32 %v543_v0, %v537_v63 }
 0x37c   :  { %v545_v3 = vadd.f32 %v544_v60, %v538_v59 }
 0x37e   :  { %v546_v5 = vadd.f32 %v545_v3, %v539_v2 }
 0x380   :  { %v547_v6 = vrot.slane %v546_v5, 4 }
 0x382   :  { %v548_v8 = vadd.f32 %v547_v6, %v546_v5 }
 0x384   :  { %v549_v10 = vrot.slane %v548_v8, 2 }
 0x386   :  { %v550_v61 = vadd.f32 %v549_v10, %v548_v8 }
 0x388   :  { %v551_v62 = vrot.slane %v550_v61, 1 }
 0x38a   :  { %v552_v11 = vadd.f32 %v551_v62, %v550_v61 }
 0x38c   :  { %v553_v12 = vmul.f32 %v552_v11, %v1171_v55 }
 0x38e   :  { %v554_v13 = vadd.f32 1e-05, %v553_v12 }
 0x390   :  { %940 = vrsqrt.f32 %v554_v13  ;;  %vm561_vm6 = vweird.f32 %v554_v13 }
 0x396   :  { %v941_v14 = vpop.eup %940 }
 0x397   :  { %v556_v15 = vmul.f32 %v941_v14, %v554_v13  ;;  %vm562_vm5 = vweird.f32 %v941_v14 }
 0x398   :  { %vm563_vm7 = vmor %vm561_vm6, %vm562_vm5 }
 0x399   :  { %v557_v16 = vmul.f32 %v941_v14, %v556_v15 }
 0x39b   :  { %v558_v17 = vmul.f32 0.5, %v557_v16 }
 0x39d   :  { %v559_v18 = vsub.f32 1.5, %v558_v17 }
 0x39f   :  { %v560_v19 = vmul.f32 %v941_v14, %v559_v18 }
 0x3a1   :  { %v564_v20 = vsel %vm563_vm7, %v941_v14, %v560_v19 }
 0x3a2   :  { %v572_v21 = vmul.f32 %v564_v20, %v531_v58  ;;  %v565_v22 = vmul.f32 %v564_v20, %v524_v40  ;;  %v566_v23 = vmul.f32 %v564_v20, %v525_v41  ;;  %v569_v28 = vmul.f32 %v564_v20, %v528_v47 }
 0x3a3   :  { %v570_v29 = vmul.f32 %v564_v20, %v529_v50  ;;  %v571_v30 = vmul.f32 %v564_v20, %v530_v54  ;;  %v567_v39 = vmul.f32 %v564_v20, %v1194_v42  ;;  %v568_v44 = vmul.f32 %v564_v20, %v1196_v43 }
 0x3a4   :  { %v573_v31 = vmax.f32 %v565_v22, 0.0  ;;  %v574_v55 = vmax.f32 %v566_v23, 0.0  ;;  %v580_v32 = vmax.f32 %v572_v21, 0.0  ;;  %v577_v33 = vmax.f32 %v569_v28, 0.0 }
 0x3a5   :  { %v578_v34 = vmax.f32 %v570_v29, 0.0  ;;  %v579_v35 = vmax.f32 %v571_v30, 0.0  ;;  %v575_v45 = vmax.f32 %v567_v39, 0.0  ;;  %v576_v40 = vmax.f32 %v568_v44, 0.0 }
 0x3a6   :  { %v581_v36 = vpack.c.bf16 %v574_v55, %v573_v31 }
 0x3a7   :  { %v583_v37 = vpack.c.bf16 %v578_v34, %v577_v33  ;;  %v584_v38 = vpack.c.bf16 %v580_v32, %v579_v35  ;;  %v582_v41 = vpack.c.bf16 %v576_v40, %v575_v45 }
 0x3a8   :  { %657 = vmatmul.bf16.vlgmr.msrb.gmra.mxu1 %v581_v36 }
 0x3b8   :  { %662 = vmatmul.bf16.gmra.mxu1 %v582_v41 }
 0x3c8   :  { %667 = vmatmul.bf16.gmra.mxu1 %v583_v37 }
 0x3d8   :  { %672 = vmatmul.bf16.gmra.mxu1 %v584_v38 }
 0x425   :  { %v658_v46 = vpop.f32.mrf.mxu1 }
 0x42d   :  { %v660_v47 = vpop.f32.mrf.mxu1 }
 0x42e   :  { %v678_v43 = vpack.c.bf16 %v660_v47, %v658_v46 }
 0x435   :  { %v663_v48 = vpop.f32.mrf.mxu1 }
 0x43d   :  { %v665_v49 = vpop.f32.mrf.mxu1 }
 0x43e   :  { %v679_v42 = vpack.c.bf16 %v665_v49, %v663_v48 }
 0x445   :  { %v668_v50 = vpop.f32.mrf.mxu1 }
 0x44d   :  { %v670_v51 = vpop.f32.mrf.mxu1 }
 0x44e   :  { %v680_v56 = vpack.c.bf16 %v670_v51, %v668_v50 }
 0x455   :  { %v673_v52 = vpop.f32.mrf.mxu1 }
 0x45d   :  { %v675_v53 = vpop.f32.mrf.mxu1 }
 0x45e   :  { %v681_v54 = vpack.c.bf16 %v675_v53, %v673_v52 }
 0x460   :  { %690 = vmatpush.bf16.msrb.mxu3 %v681_v54 }
 0x464   :  { %691 = vmatpush.bf16.msrb.mxu3 %v680_v56 }
 0x468   :  { %692 = vmatpush.bf16.msrb.mxu3 %v679_v42 }
 0x46c   :  { %693 = vmatpush.bf16.msrb.mxu3 %v678_v43 }
 0x46f   :  { %880 = vmatmul.msk.bf16.vlgmr.msrb.gmra.mxu3 %vm260_vm0, %v1155_v24 }
 0x47f   :  { %881 = vmatmul.msk.bf16.gmra.mxu3 %vm260_vm0, %v1163_v26 }
 0x48f   :  { %882 = vmatmul.msk.bf16.gmra.mxu3 %vm260_vm0, %v1157_v25 }
 0x49f   :  { %883 = vmatmul.msk.bf16.gmra.mxu3 %vm260_vm0, %v1165_v27 }
 0x4f2   :  { %v695_v58 = vpop.f32.mrf.mxu3 }
 0x4f3   :  { %v696_v63 = vadd.f32 %v935_v57, %v695_v58 }
 0x4f5   :  { %715 = vst [vmem:[#allocation11] sm:$0xff] %v696_v63 }
 0x4fa   :  { %v697_v0 = vpop.f32.mrf.mxu3 }
 0x4fb   :  { %v698_v1 = vadd.f32 %v935_v57, %v697_v0 }
 0x4fd   :  { %716 = vst [vmem:[#allocation11 + $0x8] sm:$0xff] %v698_v1 }
 0x502   :  { %v700_v24 = vpop.f32.mrf.mxu3 }
 0x503   :  { %v701_v59 = vadd.f32 %v935_v57, %v700_v24 }
 0x505   :  { %717 = vst [vmem:[#allocation11 + $0x10] sm:$0xff] %v701_v59 }
 0x50a   :  { %v702_v26 = vpop.f32.mrf.mxu3 }
 0x50b   :  { %v703_v60 = vadd.f32 %v935_v57, %v702_v26 }
 0x50d   :  { %718 = vst [vmem:[#allocation11 + $0x18] sm:$0xff] %v703_v60 }
 0x512   :  { %v705_v25 = vpop.f32.mrf.mxu3 }
 0x513   :  { %v706_v2 = vadd.f32 %v935_v57, %v705_v25 }
 0x515   :  { %719 = vst [vmem:[#allocation11 + $0x20] sm:$0xff] %v706_v2 }
 0x51a   :  { %v707_v27 = vpop.f32.mrf.mxu3 }
 0x51b   :  { %v708_v3 = vadd.f32 %v935_v57, %v707_v27 }
 0x51d   :  { %720 = vst [vmem:[#allocation11 + $0x28] sm:$0xff] %v708_v3 }
 0x522   :  { %v710_v4 = vpop.f32.mrf.mxu3 }
 0x523   :  { %v711_v5 = vadd.f32 %v935_v57, %v710_v4 }
 0x525   :  { %721 = vst [vmem:[#allocation11 + $0x30] sm:$0xff] %v711_v5 }
 0x52a   :  { %v712_v6 = vpop.f32.mrf.mxu3 }
 0x52b   :  { %v713_v7 = vadd.f32 %v935_v57, %v712_v6 }
 0x52d   :  { %722 = vst [vmem:[#allocation11 + $0x38] sm:$0xff] %v713_v7 }
 0x52e   :  { %735 = dma.vmem_to_hbm [thread:$0]  %s728_s21, 1024, %s730_s24, [#allocation4], %s1103_s25, %s1103_s25, %s1104_s26  }
 0x52f   :  { %1092 = dma.done.wait [#allocation4], 1024  }
 0x530   :  { %1093 = vsyncadd [#allocation4], 4294966272 }
 0x531   :  { %740 = vsyncpa [#allocation3], 1 }
 0x532   :  { %741 = vsyncpa [#allocation6], 1 }
 0x533   :  { %742 = vsyncpa [#allocation9], 1 }
 0x534   :  { %743 = vsyncpa [#allocation4], 1 }

</bundles_post_ra>
